<compile_context>
chip_gen: v7x
topology: tpu7x:2x2x1
jax: 0.10.0
libtpu: 0.0.40
codegen_flags: <defaults>
</compile_context>

<pallas_src>
import functools
from functools import reduce

import jax
import jax.numpy as jnp
import numpy as np
from jax.experimental import pallas as pl
from jax.experimental.pallas import tpu as pltpu  # noqa: F401  (TPU backend)


# ----------------------------- Pallas kernel --------------------------------

def _cx_kernel(xr_ref, xi_ref, or_ref, oi_ref, *, ctrl_mask, tgt_mask, stride):
    """Apply the CX column permutation to both real and imag state batches.

    out[:, j] = x[:, j ^ tgt_mask] where the control bit of j is set,
                x[:, j]            otherwise.
    Implemented with two static lane rotations + VPU selects (no MXU).
    """
    B, D = xr_ref.shape
    col = jax.lax.broadcasted_iota(jnp.int32, (B, D), 1)   # output column idx j
    ctrl_on = (col & ctrl_mask) != 0    # control bit of j set -> permute
    tgt_on = (col & tgt_mask) != 0      # target bit of j

    def apply(x):
        # roll by -stride: down[:, j] = x[:, j + stride]  (exact where tgt bit == 0)
        down = jnp.concatenate([x[:, stride:], x[:, :stride]], axis=-1)
        # roll by +stride: up[:, j]   = x[:, j - stride]  (exact where tgt bit == 1)
        up = jnp.concatenate([x[:, D - stride:], x[:, :D - stride]], axis=-1)
        flipped = jnp.where(tgt_on, up, down)               # x[:, j ^ tgt_mask]
        return jnp.where(ctrl_on, flipped, x)

    or_ref[...] = apply(xr_ref[...])
    oi_ref[...] = apply(xi_ref[...])


def cx_forward(xr, xi, *, n_qubit: int, control: int, target: int):
    """CX gate on the (real, imag) state pair with a single Pallas call.

    No gate matrix is built or transferred: the permutation is fully described
    by two Python-time bit positions (kron ordering puts qubit `i` at bit
    position n_qubit - i - 1 of the basis-state index).
    """
    B, D = xr.shape
    assert D == 2 ** n_qubit
    cbp = n_qubit - control - 1          # control-qubit bit position (LSB = 0)
    tbp = n_qubit - target - 1           # target-qubit bit position

    kernel = functools.partial(
        _cx_kernel, ctrl_mask=1 << cbp, tgt_mask=1 << tbp, stride=1 << tbp)

    return pl.pallas_call(
        kernel,
        out_shape=(jax.ShapeDtypeStruct((B, D), xr.dtype),
                   jax.ShapeDtypeStruct((B, D), xi.dtype)),
        in_specs=[pl.BlockSpec((B, D), lambda: (0, 0)),
                  pl.BlockSpec((B, D), lambda: (0, 0))],
        out_specs=(pl.BlockSpec((B, D), lambda: (0, 0)),
                   pl.BlockSpec((B, D), lambda: (0, 0))),
    )(xr, xi)


# ----------------------------- driver ---------------------------------------

if __name__ == "__main__":
    n_qubit = 4          # Hilbert-space dim = 16
    control, target = 1, 2
    dim = 2 ** n_qubit
    batch = 8            # sublane-full (8 rows)

    key = jax.random.PRNGKey(0)
    kr, ki = jax.random.split(key)
    xr = jax.random.normal(kr, (batch, dim), dtype=jnp.float32)
    xi = jax.random.normal(ki, (batch, dim), dtype=jnp.float32)

    out_r, out_i = cx_forward(xr, xi, n_qubit=n_qubit,
                              control=control, target=target)
    jax.block_until_ready((out_r, out_i))

    # Host-side (numpy, Python-time) reference — same math as the PyTorch
    # module forward.  Built with numpy so no kron chains run on device.
    def np_projector(n, basis, idx):
        proj = (np.array([[1.0, 0.0], [0.0, 0.0]], np.float32) if basis == 0
                else np.array([[0.0, 0.0], [0.0, 1.0]], np.float32))
        return reduce(np.kron, [np.eye(2 ** idx, dtype=np.float32), proj,
                                np.eye(2 ** (n - idx - 1), dtype=np.float32)])

    def np_pauli_x(n, idx):
        px = np.array([[0.0, 1.0], [1.0, 0.0]], np.float32)
        return reduce(np.kron, [np.eye(2 ** idx, dtype=np.float32), px,
                                np.eye(2 ** (n - idx - 1), dtype=np.float32)])

    p0 = np_projector(n_qubit, 0, control)
    p1 = np_projector(n_qubit, 1, control)
    xg = np_pauli_x(n_qubit, target)

    xr_np, xi_np = np.asarray(xr), np.asarray(xi)
    ref_r = xr_np @ p0 + (xr_np @ p1) @ xg
    ref_i = xi_np @ p0 + (xi_np @ p1) @ xg

    assert np.allclose(np.asarray(out_r), ref_r, atol=1e-6)
    assert np.allclose(np.asarray(out_i), ref_i, atol=1e-6)

    print("KERNEL_OK")
</pallas_src>

<mosaic_0001>
module attributes {stable_mosaic.version = 11 : i64} {
  func.func @_cx_kernel(%arg0: memref<8x16xf32, #tpu.memory_space<vmem>>, %arg1: memref<8x16xf32, #tpu.memory_space<vmem>>, %arg2: memref<8x16xf32, #tpu.memory_space<vmem>>, %arg3: memref<8x16xf32, #tpu.memory_space<vmem>>) attributes {dimension_semantics = [], scalar_prefetch = 0 : i64, scratch_operands = 0 : i64, tpu.core_type = #tpu.core_type<tc>} {
    %0 = tpu.iota {dimensions = array<i32: 1>} : vector<8x16xi32>
    %c4_i32 = arith.constant 4 : i32
    %1 = vector.broadcast %c4_i32 : i32 to vector<8x16xi32>
    %2 = arith.andi %0, %1 : vector<8x16xi32>
    %c0_i32 = arith.constant 0 : i32
    %3 = vector.broadcast %c0_i32 : i32 to vector<8x16xi32>
    %4 = arith.cmpi ne, %2, %3 : vector<8x16xi32>
    %c2_i32 = arith.constant 2 : i32
    %5 = vector.broadcast %c2_i32 : i32 to vector<8x16xi32>
    %6 = arith.andi %0, %5 : vector<8x16xi32>
    %c0_i32_0 = arith.constant 0 : i32
    %7 = vector.broadcast %c0_i32_0 : i32 to vector<8x16xi32>
    %8 = arith.cmpi ne, %6, %7 : vector<8x16xi32>
    %c0 = arith.constant 0 : index
    %c0_1 = arith.constant 0 : index
    %9 = vector.load %arg0[%c0, %c0_1] : memref<8x16xf32, #tpu.memory_space<vmem>>, vector<8x16xf32>
    %10 = vector.extract_strided_slice %9 {offsets = [0, 2], sizes = [8, 14], strides = [1, 1]} : vector<8x16xf32> to vector<8x14xf32>
    %11 = vector.extract_strided_slice %9 {offsets = [0, 0], sizes = [8, 2], strides = [1, 1]} : vector<8x16xf32> to vector<8x2xf32>
    %12 = tpu.concatenate %10, %11 in 1 : vector<8x14xf32>, vector<8x2xf32> -> vector<8x16xf32>
    %13 = vector.extract_strided_slice %9 {offsets = [0, 14], sizes = [8, 2], strides = [1, 1]} : vector<8x16xf32> to vector<8x2xf32>
    %14 = vector.extract_strided_slice %9 {offsets = [0, 0], sizes = [8, 14], strides = [1, 1]} : vector<8x16xf32> to vector<8x14xf32>
    %15 = tpu.concatenate %13, %14 in 1 : vector<8x2xf32>, vector<8x14xf32> -> vector<8x16xf32>
    %16 = arith.select %8, %15, %12 : vector<8x16xi1>, vector<8x16xf32>
    %17 = arith.select %4, %16, %9 : vector<8x16xi1>, vector<8x16xf32>
    %c0_2 = arith.constant 0 : index
    %c0_3 = arith.constant 0 : index
    %18 = vector.load %arg2[%c0_2, %c0_3] : memref<8x16xf32, #tpu.memory_space<vmem>>, vector<8x16xf32>
    tpu.vector_store %arg2[%c0_2, %c0_3], %17 {strides = array<i32>} : memref<8x16xf32, #tpu.memory_space<vmem>>, vector<8x16xf32>,
    %c0_4 = arith.constant 0 : index
    %c0_5 = arith.constant 0 : index
    %19 = vector.load %arg1[%c0_4, %c0_5] : memref<8x16xf32, #tpu.memory_space<vmem>>, vector<8x16xf32>
    %20 = vector.extract_strided_slice %19 {offsets = [0, 2], sizes = [8, 14], strides = [1, 1]} : vector<8x16xf32> to vector<8x14xf32>
    %21 = vector.extract_strided_slice %19 {offsets = [0, 0], sizes = [8, 2], strides = [1, 1]} : vector<8x16xf32> to vector<8x2xf32>
    %22 = tpu.concatenate %20, %21 in 1 : vector<8x14xf32>, vector<8x2xf32> -> vector<8x16xf32>
    %23 = vector.extract_strided_slice %19 {offsets = [0, 14], sizes = [8, 2], strides = [1, 1]} : vector<8x16xf32> to vector<8x2xf32>
    %24 = vector.extract_strided_slice %19 {offsets = [0, 0], sizes = [8, 14], strides = [1, 1]} : vector<8x16xf32> to vector<8x14xf32>
    %25 = tpu.concatenate %23, %24 in 1 : vector<8x2xf32>, vector<8x14xf32> -> vector<8x16xf32>
    %26 = arith.select %8, %25, %22 : vector<8x16xi1>, vector<8x16xf32>
    %27 = arith.select %4, %26, %19 : vector<8x16xi1>, vector<8x16xf32>
    %c0_6 = arith.constant 0 : index
    %c0_7 = arith.constant 0 : index
    %28 = vector.load %arg3[%c0_6, %c0_7] : memref<8x16xf32, #tpu.memory_space<vmem>>, vector<8x16xf32>
    tpu.vector_store %arg3[%c0_6, %c0_7], %27 {strides = array<i32>} : memref<8x16xf32, #tpu.memory_space<vmem>>, vector<8x16xf32>,
    return
  }
}

</mosaic_0001>

<bundles_post_ra>
// kernel: tpu_custom_call.1
= control target key start
LH: loop header
LB: loop body
LE: loop exit
PB: predicated region body
PF: predicated region fallthrough
CT: control target
= control target key end

     0   :  { %9 = vsyncpa [#allocation3], 0  ;;  %s318_s0 = inlined_call_operand.hbm [shape: f32[8,16], index: 0, kind: input, shape index: {}]   ;;  %s319_s1 = inlined_call_operand.hbm [shape: f32[8,16], index: 1, kind: input, shape index: {}]   ;;  %s320_s2 = inlined_call_operand.hbm [shape: f32[8,16], index: 2, kind: output, shape index: {0}]   ;;  %s321_s3 = inlined_call_operand.hbm [shape: f32[8,16], index: 3, kind: output, shape index: {1}]  }
   0x1   :  { %10 = vsyncpa [#allocation6], 0 }
   0x2   :  { %11 = vsyncpa [#allocation4], 0 }
   0x3   :  { %12 = vsyncpa [#allocation9], 0  ;;  %s220_s12 = smov [#allocation2]   ;;  %s221_s14 = smov [#allocation5]  }
   0x4   :  { %s19_s13 = sshll.u32 %s220_s12, 4  ;;  %s29_s15 = sshll.u32 %s221_s14, 4  ;;  %s20_s13 = int_to_ptr.vmem [resolvable:$true] %s19_s13  ;;  %s30_s15 = int_to_ptr.vmem [resolvable:$true] %s29_s15 }
   0x5   :  { %s124_s18 = scalar_lea.hbm %s318_s0, 128 }
   0x6   :  { %p125_p0 = scmp.ne.s32.totalorder %s318_s0, %s124_s18  ;;  %p128_p1 = scmp.lt.u32.totalorder %s124_s18, %s318_s0 }
   0x8   :  { %p130_p2 = pnand %p128_p1, %p125_p0 }
   0xa   :  { %133 = shalt.err (!%p130_p2)
}
   0xb   :  { %s134_s23 = scalar_lea.vmem %s20_s13, 128  ;;  %p139_p4 = scmp.lt.s32.totalorder %s20_s13, %s20_s13 }
   0xc   :  { %p135_p3 = scmp.ne.s32.totalorder %s20_s13, %s134_s23  ;;  %p140_p5 = scmp.lt.s32.totalorder %s134_s23, %s134_s23 }
   0xe   :  { %p141_p6 = por %p140_p5, %p139_p4 }
  0x10   :  { %p142_p7 = pnand %p141_p6, %p135_p3 }
  0x12   :  { %145 = shalt.err (!%p142_p7)
}
  0x13   :  { %22 = dma.hbm_to_vmem [thread:$0]  %s318_s0, 128, %s20_s13, [#allocation3]  }
  0x14   :  { %s146_s28 = scalar_lea.hbm %s319_s1, 128 }
  0x15   :  { %p147_p8 = scmp.ne.s32.totalorder %s319_s1, %s146_s28  ;;  %p150_p9 = scmp.lt.u32.totalorder %s146_s28, %s319_s1 }
  0x17   :  { %p152_p10 = pnand %p150_p9, %p147_p8 }
  0x19   :  { %155 = shalt.err (!%p152_p10)
}
  0x1a   :  { %s156_s6 = scalar_lea.vmem %s30_s15, 128  ;;  %p161_p12 = scmp.lt.s32.totalorder %s30_s15, %s30_s15 }
  0x1b   :  { %p157_p11 = scmp.ne.s32.totalorder %s30_s15, %s156_s6  ;;  %p162_p13 = scmp.lt.s32.totalorder %s156_s6, %s156_s6 }
  0x1d   :  { %p163_p0 = por %p162_p13, %p161_p12 }
  0x1f   :  { %p164_p1 = pnand %p163_p0, %p157_p11 }
  0x21   :  { %167 = shalt.err (!%p164_p1)
}
  0x22   :  { %32 = dma.hbm_to_vmem [thread:$0]  %s319_s1, 128, %s30_s15, [#allocation6]  }
  0x23   :  { %212 = dma.done.wait [#allocation3], 128  }
  0x24   :  { %213 = vsyncadd [#allocation3], 4294967168 }
  0x25   :  { %214 = dma.done.wait [#allocation6], 128  }
  0x26   :  { %215 = vsyncadd [#allocation6], 4294967168  ;;  %v45_v0 = vld [vmem:[#allocation2] sm:$0xff]  ;;  %s222_s8 = smov 114   ;;  %s223_s9 = smov 126   ;;  %v67_v1 = vld [vmem:[#allocation5] sm:$0xff]  ;;  %v39_v2 = vlaneseq }
  0x27   :  { %55 = vrot.lane.b32.xlu1 %v45_v0, %s222_s8  ;;  %47 = vrot.lane.b32.xlu0 %v45_v0, %s223_s9  ;;  %s224_s10 = smov 2   ;;  %s225_s11 = smov 14   ;;  %vm61_vm0 = vcmask 15360   ;;  %vm53_vm1 = vcmask 113664   ;;  %vm65_vm4 = vcmask 130048  }
  0x28   :  { %v40_v3 = vand.u32 127, %v39_v2  ;;  %s226_s1 = smov [#allocation7]  }
  0x29   :  { %s92_s12 = sshll.u32 %s226_s1, 4  ;;  %s93_s12 = int_to_ptr.vmem [resolvable:$true] %s92_s12 }
  0x2a   :  { %v43_v4 = vand.u32 2, %v40_v3  ;;  %v41_v7 = vand.u32 4, %v40_v3  ;;  %s168_s13 = scalar_lea.vmem %s93_s12, 128  ;;  %p173_p3 = scmp.lt.s32.totalorder %s93_s12, %s93_s12 }
  0x2b   :  { %58 = vrot.lane.b32.xlu1 %v45_v0, %s224_s10  ;;  %50 = vrot.lane.b32.xlu0 %v45_v0, %s225_s11  ;;  %p169_p2 = scmp.ne.s32.totalorder %s93_s12, %s168_s13  ;;  %p174_p4 = scmp.lt.s32.totalorder %s168_s13, %s168_s13 }
  0x2c   :  { %vm272_vm2 = vcmp.ne.s32.totalorder %v43_v4, 0  ;;  %vm276_vm3 = vcmp.ne.s32.totalorder %v41_v7, 0 }
  0x2d   :  { %p175_p5 = por %p174_p4, %p173_p3 }
  0x2f   :  { %72 = vrot.lane.b32.xlu1 %v67_v1, %s225_s11  ;;  %69 = vrot.lane.b32.xlu0 %v67_v1, %s223_s9  ;;  %p176_p6 = pnand %p175_p5, %p169_p2 }
  0x33   :  { %79 = vrot.lane.b32.xlu1 %v67_v1, %s224_s10  ;;  %76 = vrot.lane.b32.xlu0 %v67_v1, %s222_s8 }
  0x99   :  { %v56_v5 = vpop.permute.xlu1 %55  ;;  %v48_v6 = vpop.permute.xlu0 %47 }
  0x9d   :  { %v59_v9 = vpop.permute.xlu1 %58  ;;  %v51_v10 = vpop.permute.xlu0 %50 }
  0x9e   :  { %v62_v12 = vsel %vm61_vm0, %v56_v5, %v59_v9  ;;  %v54_v13 = vsel %vm53_vm1, %v48_v6, %v51_v10 }
  0x9f   :  { %v63_v14 = vsel %vm272_vm2, %v62_v12, %v54_v13 }
  0xa0   :  { %v64_v15 = vsel %vm276_vm3, %v63_v14, %v45_v0 }
  0xa1   :  { %v73_v16 = vpop.permute.xlu1 %72  ;;  %v70_v17 = vpop.permute.xlu0 %69  ;;  %66 = vst.msk [vmem:[#allocation7] sm:$0xff] %vm65_vm4, %v64_v15 }
  0xa2   :  { %179 = shalt.err (!%p176_p6)
}
  0xa3   :  { %s180_s16 = scalar_lea.hbm %s320_s2, 128 }
  0xa4   :  { %p181_p7 = scmp.ne.s32.totalorder %s320_s2, %s180_s16  ;;  %p184_p8 = scmp.lt.u32.totalorder %s180_s16, %s320_s2 }
  0xa6   :  { %p186_p9 = pnand %p184_p8, %p181_p7 }
  0xa8   :  { %189 = shalt.err (!%p186_p9)
}
  0xa9   :  { %95 = dma.vmem_to_hbm [thread:$0]  %s93_s12, 128, %s320_s2, [#allocation4]   ;;  %v80_v18 = vpop.permute.xlu1 %79  ;;  %v77_v19 = vpop.permute.xlu0 %76  ;;  %v75_v20 = vsel %vm53_vm1, %v70_v17, %v73_v16 }
  0xaa   :  { %s227_s23 = smov [#allocation8]   ;;  %v82_v21 = vsel %vm61_vm0, %v77_v19, %v80_v18 }
  0xab   :  { %s102_s24 = sshll.u32 %s227_s23, 4  ;;  %v83_v22 = vsel %vm272_vm2, %v82_v21, %v75_v20  ;;  %s103_s24 = int_to_ptr.vmem [resolvable:$true] %s102_s24 }
  0xac   :  { %v84_v23 = vsel %vm276_vm3, %v83_v22, %v67_v1  ;;  %s190_s25 = scalar_lea.vmem %s103_s24, 128  ;;  %p195_p11 = scmp.lt.s32.totalorder %s103_s24, %s103_s24 }
  0xad   :  { %85 = vst.msk [vmem:[#allocation8] sm:$0xff] %vm65_vm4, %v84_v23  ;;  %p191_p10 = scmp.ne.s32.totalorder %s103_s24, %s190_s25  ;;  %p196_p12 = scmp.lt.s32.totalorder %s190_s25, %s190_s25 }
  0xaf   :  { %p197_p13 = por %p196_p12, %p195_p11 }
  0xb1   :  { %p198_p0 = pnand %p197_p13, %p191_p10 }
  0xb3   :  { %201 = shalt.err (!%p198_p0)
}
  0xb4   :  { %s202_s27 = scalar_lea.hbm %s321_s3, 128 }
  0xb5   :  { %p203_p1 = scmp.ne.s32.totalorder %s321_s3, %s202_s27  ;;  %p206_p2 = scmp.lt.u32.totalorder %s202_s27, %s321_s3 }
  0xb7   :  { %p208_p3 = pnand %p206_p2, %p203_p1 }
  0xb9   :  { %211 = shalt.err (!%p208_p3)
}
  0xba   :  { %105 = dma.vmem_to_hbm [thread:$0]  %s103_s24, 128, %s321_s3, [#allocation9]  }
  0xbb   :  { %216 = dma.done.wait [#allocation4], 128  }
  0xbc   :  { %217 = vsyncadd [#allocation4], 4294967168 }
  0xbd   :  { %218 = dma.done.wait [#allocation9], 128  }
  0xbe   :  { %219 = vsyncadd [#allocation9], 4294967168 }
  0xbf   :  { %112 = vsyncpa [#allocation3], 1 }
  0xc0   :  { %113 = vsyncpa [#allocation6], 1 }
  0xc1   :  { %114 = vsyncpa [#allocation4], 1 }
  0xc2   :  { %115 = vsyncpa [#allocation9], 1 }

</bundles_post_ra>
